<compile_context>
chip_gen: v7x
topology: tpu7x:2x2x1
jax: 0.10.0
libtpu: 0.0.40
codegen_flags: <defaults>
</compile_context>

<pallas_src>
import jax
import jax.numpy as jnp
from jax.experimental import pallas as pl
from jax.experimental.pallas import tpu as pltpu

_LANE = 128
_SUBLANE = 8


def _round_up(n, m):
    return ((n + m - 1) // m) * m


def _pad_to(a, shape):
    pads = [(0, t - s) for s, t in zip(a.shape, shape)]
    return jnp.pad(a, pads)


# --------------------------------------------------------------------------
# Kernel: one batch tile of decoder(encoder(x)).
# --------------------------------------------------------------------------
def _inout_mlp_kernel(x_ref, w1_ref, w2_ref, w3_ref, w4_ref, bh_ref, b4_ref,
                      y_ref):
    x = x_ref[...]                                    # [TB, D_in_p]  f32
    bh = bh_ref[...]                                  # [3, H_p]      f32 (b1,b2,b3)

    # ---- encoder: relu(x @ W1 + b1) @ W2 + b2 ----
    h = jnp.dot(x.astype(jnp.bfloat16), w1_ref[...],
                preferred_element_type=jnp.float32)
    h = jnp.maximum(h + bh[0:1, :], 0.0)              # bias/ReLU in f32 (VPU)
    enc = jnp.dot(h.astype(jnp.bfloat16), w2_ref[...],
                  preferred_element_type=jnp.float32) + bh[1:2, :]

    # ---- decoder: relu(enc @ W3 + b3) @ W4 + b4 ----
    g = jnp.dot(enc.astype(jnp.bfloat16), w3_ref[...],
                preferred_element_type=jnp.float32)
    g = jnp.maximum(g + bh[2:3, :], 0.0)
    y = jnp.dot(g.astype(jnp.bfloat16), w4_ref[...],
                preferred_element_type=jnp.float32) + b4_ref[...]

    y_ref[...] = y.astype(y_ref.dtype)


# --------------------------------------------------------------------------
# Parameter preparation: pad feature dims to 128, cast weights to bf16,
# pack hidden biases.  Zero padding is semantics-preserving (padded weight
# rows/cols and bias entries are 0, so padded hidden units stay 0).
# --------------------------------------------------------------------------
def prepare_params(params):
    w1, b1 = params["w1"], params["b1"]
    w2, b2 = params["w2"], params["b2"]
    w3, b3 = params["w3"], params["b3"]
    w4, b4 = params["w4"], params["b4"]

    d_in, hidden = w1.shape
    d_out = w4.shape[1]
    d_in_p = _round_up(d_in, _LANE)
    h_p = _round_up(hidden, _LANE)
    d_out_p = _round_up(d_out, _LANE)

    padded = {
        "w1": _pad_to(w1, (d_in_p, h_p)).astype(jnp.bfloat16),
        "w2": _pad_to(w2, (h_p, h_p)).astype(jnp.bfloat16),
        "w3": _pad_to(w3, (h_p, h_p)).astype(jnp.bfloat16),
        "w4": _pad_to(w4, (h_p, d_out_p)).astype(jnp.bfloat16),
        "bh": jnp.stack([_pad_to(b1, (h_p,)),
                         _pad_to(b2, (h_p,)),
                         _pad_to(b3, (h_p,))]).astype(jnp.float32),
        "b4": _pad_to(b4, (d_out_p,)).reshape(1, d_out_p).astype(jnp.float32),
    }
    dims = dict(d_in=d_in, hidden=hidden, d_out=d_out,
                d_in_p=d_in_p, h_p=h_p, d_out_p=d_out_p)
    return padded, dims


def _choose_tile_rows(b_rounded):
    # 256-row tiles hit ~85% of HBM roofline in the measured sweep and keep
    # 2 activations x 2 double-buffers + resident weights well under the
    # 32 MiB scoped-VMEM budget (safe even on v7x's 64 MiB physical VMEM).
    return min(256, b_rounded)


# --------------------------------------------------------------------------
# Wrapper: pads batch/features, tiles the batch, slices the result back.
# --------------------------------------------------------------------------
def inout_model_forward(x, padded_params, dims):
    B, d_in = x.shape
    assert d_in == dims["d_in"]
    d_in_p, h_p, d_out_p = dims["d_in_p"], dims["h_p"], dims["d_out_p"]

    tb = _choose_tile_rows(_round_up(B, _SUBLANE))
    b_p = _round_up(B, tb)
    x_p = _pad_to(x.astype(jnp.float32), (b_p, d_in_p))

    grid = (b_p // tb,)

    flops = 2 * b_p * (d_in_p * h_p + 2 * h_p * h_p + h_p * d_out_p)
    bytes_accessed = (2 * (d_in_p * h_p + 2 * h_p * h_p + h_p * d_out_p)   # bf16 weights
                      + 4 * (3 * h_p + d_out_p)                            # f32 biases
                      + 4 * (b_p * d_in_p + b_p * d_out_p))                # f32 in/out

    y_p = pl.pallas_call(
        _inout_mlp_kernel,
        out_shape=jax.ShapeDtypeStruct((b_p, d_out_p), jnp.float32),
        grid=grid,
        in_specs=[
            pl.BlockSpec((tb, d_in_p), lambda i: (i, 0)),      # x batch tile
            pl.BlockSpec((d_in_p, h_p), lambda i: (0, 0)),     # w1 (VMEM-resident)
            pl.BlockSpec((h_p, h_p), lambda i: (0, 0)),        # w2
            pl.BlockSpec((h_p, h_p), lambda i: (0, 0)),        # w3
            pl.BlockSpec((h_p, d_out_p), lambda i: (0, 0)),    # w4
            pl.BlockSpec((3, h_p), lambda i: (0, 0)),          # packed b1/b2/b3
            pl.BlockSpec((1, d_out_p), lambda i: (0, 0)),      # b4
        ],
        out_specs=pl.BlockSpec((tb, d_out_p), lambda i: (i, 0)),
        compiler_params=pltpu.CompilerParams(
            dimension_semantics=("parallel",),
            vmem_limit_bytes=32 * 1024 * 1024),
        cost_estimate=pl.CostEstimate(
            flops=flops, transcendentals=0, bytes_accessed=bytes_accessed),
    )(x_p, padded_params["w1"], padded_params["w2"], padded_params["w3"],
      padded_params["w4"], padded_params["bh"], padded_params["b4"])

    return y_p[:B, :dims["d_out"]]


# --------------------------------------------------------------------------
# Init + pure-JAX reference (same bf16-operand / f32-accumulate scheme).
# --------------------------------------------------------------------------
def init_params(key, d_in, hidden, d_out):
    ks = jax.random.split(key, 8)
    scale = 0.05

    def w(k, shape):
        return (scale * jax.random.normal(k, shape)).astype(jnp.float32)

    return {
        "w1": w(ks[0], (d_in, hidden)),   "b1": w(ks[1], (hidden,)),
        "w2": w(ks[2], (hidden, hidden)), "b2": w(ks[3], (hidden,)),
        "w3": w(ks[4], (hidden, hidden)), "b3": w(ks[5], (hidden,)),
        "w4": w(ks[6], (hidden, d_out)),  "b4": w(ks[7], (d_out,)),
    }


def reference_forward(x, p):
    def mm(a, w):
        return jnp.dot(a.astype(jnp.bfloat16), w.astype(jnp.bfloat16),
                       preferred_element_type=jnp.float32)

    h = jnp.maximum(mm(x, p["w1"]) + p["b1"], 0.0)
    enc = mm(h, p["w2"]) + p["b2"]
    g = jnp.maximum(mm(enc, p["w3"]) + p["b3"], 0.0)
    return mm(g, p["w4"]) + p["b4"]


if __name__ == "__main__":
    # Deliberately non-128-aligned feature dims; wrapper pads them.
    B, D_IN, HIDDEN, D_OUT = 512, 48, 96, 40

    key = jax.random.PRNGKey(0)
    kx, kp = jax.random.split(key)
    x = jax.random.normal(kx, (B, D_IN), dtype=jnp.float32)
    params = init_params(kp, D_IN, HIDDEN, D_OUT)

    padded_params, dims = prepare_params(params)
    y = inout_model_forward(x, padded_params, dims)
    jax.block_until_ready(y)

    y_ref = reference_forward(x, params)
    assert y.shape == (B, D_OUT), y.shape
    assert jnp.allclose(y, y_ref, atol=2e-3, rtol=2e-3), \
        float(jnp.max(jnp.abs(y - y_ref)))

    print("KERNEL_OK")
</pallas_src>

<mosaic_0001>
module attributes {stable_mosaic.version = 11 : i64} {
  func.func @_inout_mlp_kernel(%arg0: i32, %arg1: memref<256x128xf32, #tpu.memory_space<vmem>>, %arg2: memref<128x128xbf16, #tpu.memory_space<vmem>>, %arg3: memref<128x128xbf16, #tpu.memory_space<vmem>>, %arg4: memref<128x128xbf16, #tpu.memory_space<vmem>>, %arg5: memref<128x128xbf16, #tpu.memory_space<vmem>>, %arg6: memref<3x128xf32, #tpu.memory_space<vmem>>, %arg7: memref<1x128xf32, #tpu.memory_space<vmem>>, %arg8: memref<256x128xf32, #tpu.memory_space<vmem>>) attributes {dimension_semantics = [#tpu.dimension_semantics<parallel>], iteration_bounds = array<i64: 2>, scalar_prefetch = 0 : i64, scratch_operands = 0 : i64, tpu.core_type = #tpu.core_type<tc>, window_params = [{transform_indices = @transform_0, window_bounds = array<i64: 256, 128>}, {pipeline_mode = #tpu.pipeline_mode<synchronous>, transform_indices = @transform_1, window_bounds = array<i64: 128, 128>}, {pipeline_mode = #tpu.pipeline_mode<synchronous>, transform_indices = @transform_2, window_bounds = array<i64: 128, 128>}, {pipeline_mode = #tpu.pipeline_mode<synchronous>, transform_indices = @transform_3, window_bounds = array<i64: 128, 128>}, {pipeline_mode = #tpu.pipeline_mode<synchronous>, transform_indices = @transform_4, window_bounds = array<i64: 128, 128>}, {pipeline_mode = #tpu.pipeline_mode<synchronous>, transform_indices = @transform_5, window_bounds = array<i64: 3, 128>}, {pipeline_mode = #tpu.pipeline_mode<synchronous>, transform_indices = @transform_6, window_bounds = array<i64: 1, 128>}, {transform_indices = @transform_7, window_bounds = array<i64: 256, 128>}]} {
    %c0 = arith.constant 0 : index
    %c0_0 = arith.constant 0 : index
    %0 = vector.load %arg1[%c0, %c0_0] : memref<256x128xf32, #tpu.memory_space<vmem>>, vector<256x128xf32>
    %c0_1 = arith.constant 0 : index
    %c0_2 = arith.constant 0 : index
    %1 = vector.load %arg6[%c0_1, %c0_2] : memref<3x128xf32, #tpu.memory_space<vmem>>, vector<3x128xf32>
    %2 = arith.truncf %0 : vector<256x128xf32> to vector<256x128xbf16>
    %c0_3 = arith.constant 0 : index
    %c0_4 = arith.constant 0 : index
    %3 = vector.load %arg2[%c0_3, %c0_4] : memref<128x128xbf16, #tpu.memory_space<vmem>>, vector<128x128xbf16>
    %cst = arith.constant dense<0.000000e+00> : vector<256x128xf32>
    %4 = tpu.matmul %2, %3, %cst {dimension_numbers = #tpu.dot_dimension_numbers<[1], [0], [0], [1], [0, 0, 1, 1], [], []>} : vector<256x128xbf16>, vector<128x128xbf16>, vector<256x128xf32> -> vector<256x128xf32>
    %5 = vector.extract_strided_slice %1 {offsets = [0, 0], sizes = [1, 128], strides = [1, 1]} : vector<3x128xf32> to vector<1x128xf32>
    %6 = vector.broadcast %5 : vector<1x128xf32> to vector<256x128xf32>
    %7 = arith.addf %4, %6 : vector<256x128xf32>
    %cst_5 = arith.constant 0.000000e+00 : f32
    %8 = vector.broadcast %cst_5 : f32 to vector<256x128xf32>
    %9 = arith.maximumf %7, %8 : vector<256x128xf32>
    %10 = arith.truncf %9 : vector<256x128xf32> to vector<256x128xbf16>
    %c0_6 = arith.constant 0 : index
    %c0_7 = arith.constant 0 : index
    %11 = vector.load %arg3[%c0_6, %c0_7] : memref<128x128xbf16, #tpu.memory_space<vmem>>, vector<128x128xbf16>
    %cst_8 = arith.constant dense<0.000000e+00> : vector<256x128xf32>
    %12 = tpu.matmul %10, %11, %cst_8 {dimension_numbers = #tpu.dot_dimension_numbers<[1], [0], [0], [1], [0, 0, 1, 1], [], []>} : vector<256x128xbf16>, vector<128x128xbf16>, vector<256x128xf32> -> vector<256x128xf32>
    %13 = vector.extract_strided_slice %1 {offsets = [1, 0], sizes = [1, 128], strides = [1, 1]} : vector<3x128xf32> to vector<1x128xf32>
    %14 = vector.broadcast %13 : vector<1x128xf32> to vector<256x128xf32>
    %15 = arith.addf %12, %14 : vector<256x128xf32>
    %16 = arith.truncf %15 : vector<256x128xf32> to vector<256x128xbf16>
    %c0_9 = arith.constant 0 : index
    %c0_10 = arith.constant 0 : index
    %17 = vector.load %arg4[%c0_9, %c0_10] : memref<128x128xbf16, #tpu.memory_space<vmem>>, vector<128x128xbf16>
    %cst_11 = arith.constant dense<0.000000e+00> : vector<256x128xf32>
    %18 = tpu.matmul %16, %17, %cst_11 {dimension_numbers = #tpu.dot_dimension_numbers<[1], [0], [0], [1], [0, 0, 1, 1], [], []>} : vector<256x128xbf16>, vector<128x128xbf16>, vector<256x128xf32> -> vector<256x128xf32>
    %19 = vector.extract_strided_slice %1 {offsets = [2, 0], sizes = [1, 128], strides = [1, 1]} : vector<3x128xf32> to vector<1x128xf32>
    %20 = vector.broadcast %19 : vector<1x128xf32> to vector<256x128xf32>
    %21 = arith.addf %18, %20 : vector<256x128xf32>
    %cst_12 = arith.constant 0.000000e+00 : f32
    %22 = vector.broadcast %cst_12 : f32 to vector<256x128xf32>
    %23 = arith.maximumf %21, %22 : vector<256x128xf32>
    %24 = arith.truncf %23 : vector<256x128xf32> to vector<256x128xbf16>
    %c0_13 = arith.constant 0 : index
    %c0_14 = arith.constant 0 : index
    %25 = vector.load %arg5[%c0_13, %c0_14] : memref<128x128xbf16, #tpu.memory_space<vmem>>, vector<128x128xbf16>
    %cst_15 = arith.constant dense<0.000000e+00> : vector<256x128xf32>
    %26 = tpu.matmul %24, %25, %cst_15 {dimension_numbers = #tpu.dot_dimension_numbers<[1], [0], [0], [1], [0, 0, 1, 1], [], []>} : vector<256x128xbf16>, vector<128x128xbf16>, vector<256x128xf32> -> vector<256x128xf32>
    %c0_16 = arith.constant 0 : index
    %c0_17 = arith.constant 0 : index
    %27 = vector.load %arg7[%c0_16, %c0_17] : memref<1x128xf32, #tpu.memory_space<vmem>>, vector<1x128xf32>
    %28 = vector.broadcast %27 : vector<1x128xf32> to vector<256x128xf32>
    %29 = arith.addf %26, %28 : vector<256x128xf32>
    %c0_18 = arith.constant 0 : index
    %c0_19 = arith.constant 0 : index
    %30 = vector.load %arg8[%c0_18, %c0_19] : memref<256x128xf32, #tpu.memory_space<vmem>>, vector<256x128xf32>
    tpu.vector_store %arg8[%c0_18, %c0_19], %29 {strides = array<i32>} : memref<256x128xf32, #tpu.memory_space<vmem>>, vector<256x128xf32>,
    return
  }
  func.func @transform_0(%arg0: i32) -> (i32, i32) {
    %c0_i32 = arith.constant 0 : i32
    %c0_i32_0 = arith.constant 0 : i32
    return %arg0, %c0_i32 : i32, i32
  }
  func.func @transform_1(%arg0: i32) -> (i32, i32) {
    %c0_i32 = arith.constant 0 : i32
    %c0_i32_0 = arith.constant 0 : i32
    %c0_i32_1 = arith.constant 0 : i32
    return %c0_i32, %c0_i32_0 : i32, i32
  }
  func.func @transform_2(%arg0: i32) -> (i32, i32) {
    %c0_i32 = arith.constant 0 : i32
    %c0_i32_0 = arith.constant 0 : i32
    %c0_i32_1 = arith.constant 0 : i32
    return %c0_i32, %c0_i32_0 : i32, i32
  }
  func.func @transform_3(%arg0: i32) -> (i32, i32) {
    %c0_i32 = arith.constant 0 : i32
    %c0_i32_0 = arith.constant 0 : i32
    %c0_i32_1 = arith.constant 0 : i32
    return %c0_i32, %c0_i32_0 : i32, i32
  }
  func.func @transform_4(%arg0: i32) -> (i32, i32) {
    %c0_i32 = arith.constant 0 : i32
    %c0_i32_0 = arith.constant 0 : i32
    %c0_i32_1 = arith.constant 0 : i32
    return %c0_i32, %c0_i32_0 : i32, i32
  }
  func.func @transform_5(%arg0: i32) -> (i32, i32) {
    %c0_i32 = arith.constant 0 : i32
    %c0_i32_0 = arith.constant 0 : i32
    %c0_i32_1 = arith.constant 0 : i32
    return %c0_i32, %c0_i32_0 : i32, i32
  }
  func.func @transform_6(%arg0: i32) -> (i32, i32) {
    %c0_i32 = arith.constant 0 : i32
    %c0_i32_0 = arith.constant 0 : i32
    %c0_i32_1 = arith.constant 0 : i32
    return %c0_i32, %c0_i32_0 : i32, i32
  }
  func.func @transform_7(%arg0: i32) -> (i32, i32) {
    %c0_i32 = arith.constant 0 : i32
    %c0_i32_0 = arith.constant 0 : i32
    return %arg0, %c0_i32 : i32, i32
  }
}

</mosaic_0001>

<bundles_post_ra>
// kernel: tpu_custom_call.1
= control target key start
LH: loop header
LB: loop body
LE: loop exit
PB: predicated region body
PF: predicated region fallthrough
CT: control target
= control target key end

     0   :  { %12 = vsyncpa [#allocation3], 0  ;;  %s2849_s0 = inlined_call_operand.hbm [shape: f32[512,128], index: 0, kind: input, shape index: {}]   ;;  %s2850_s1 = inlined_call_operand.hbm [shape: bf16[128,128], index: 1, kind: input, shape index: {}]   ;;  %s2851_s2 = inlined_call_operand.hbm [shape: bf16[128,128], index: 2, kind: input, shape index: {}]   ;;  %s2852_s3 = inlined_call_operand.hbm [shape: bf16[128,128], index: 3, kind: input, shape index: {}]   ;;  %s2853_s4 = inlined_call_operand.hbm [shape: bf16[128,128], index: 4, kind: input, shape index: {}]   ;;  %s2854_s5 = inlined_call_operand.vmem [shape: f32[3,128], index: 5, kind: input, shape index: {}]   ;;  %s2855_s6 = inlined_call_operand.vmem [shape: f32[1,128], index: 6, kind: input, shape index: {}]   ;;  %s2856_s7 = inlined_call_operand.hbm [shape: f32[512,128], index: 7, kind: output, shape index: {}]  }
   0x1   :  { %14 = vsyncpa [#allocation3 + $0x1], 0 }
   0x2   :  { %15 = vsyncpa [#allocation6], 0 }
   0x3   :  { %16 = vsyncpa [#allocation9], 0 }
   0x4   :  { %17 = vsyncpa [#allocation4], 0 }
   0x5   :  { %19 = vsyncpa [#allocation4 + $0x1], 0  ;;  %s2335_s24 = smov 0   ;;  %s2337_s25 = smov 0  }
   0x6   :  { %s2339_s26 = smov 0   ;;  %s2341_s27 = smov 0  }
   0x7 LB: > { %s2356_s28 = sadd.s32 4294967295, %s2281_s27   ;;  %s1595_s29 = sadd.s32 4294967294, %s2281_s27   ;;  %s2281_s27 = sphi %s2341_s27, %s2882_s27   ;;  %s2277_s26 = sphi %s2339_s26, %s2881_s26   ;;  %s2273_s25 = sphi %s2337_s25, %s2880_s25   ;;  %s2269_s24 = sphi %s2335_s24, %s2879_s24  }
   0x8   : > { %p45_p0 = scmp.ne.s32.totalorder %s2273_s25, %s2269_s24  ;;  %p2857_p1 = scmp.eq.s32.totalorder %s2356_s28, 0 }
   0x9   : > { %p201_p3 = scmp.eq.s32.totalorder %s1595_s29, 1  ;;  %p1596_p5 = scmp.ge.s32.totalorder %s2281_s27, 1 }
   0xa   : > { %p2365_p4 = por %p2857_p1, %p45_p0  ;;  %p208_p7 = scmp.lt.s32.totalorder %s2281_s27, 3 }
   0xb   : > { %p2370_p6 = por %p201_p3, %p45_p0  ;;  %s2283_s10 = smov [#allocation5]  }
   0xc   : > { %s2861_s30 = scalar_select %p2365_p4, 1, 0 }
   0xd   : > { %s2862_s8 = scalar_select %p2370_p6, 1, 0 }
   0xe   : > { %p2375_p8 = pnand %p1596_p5, %p208_p7  ;;  %s220_s11 = sshll.u32 %s2283_s10, 4  ;;  %s2379_s11 = int_to_ptr.vmem [resolvable:$true] %s220_s11 }
   0xf   : > { %2863 = sst [smem:[#allocation16_spill]] %s2862_s8  ;;  %s2284_s13 = smov [#allocation8]  }
  0x10   : > { %s2864_s9 = scalar_select %p2375_p8, 1, 0 }
  0x11   : > { %p1960_p9 = pneg %p2375_p8  ;;  %s246_s14 = sshll.u32 %s2284_s13, 4  ;;  %s2390_s14 = int_to_ptr.vmem [resolvable:$true] %s246_s14 }
  0x12   : > { %s2285_s15 = smov [#allocation7]   ;;  %s2065_s19 = scalar_lea.hbm %s2850_s1, 1024 }
  0x13   : > { %p2386_p11 = pnand %p1960_p9, %p2857_p1  ;;  %s2392_s16 = sshll.u32 %s2285_s15, 4  ;;  %s234_s16 = int_to_ptr.vmem [resolvable:$true] %s2392_s16 }
  0x14   : > { %p2066_p12 = scmp.ne.s32.totalorder %s2850_s1, %s2065_s19  ;;  %p2072_p5 = scmp.lt.u32.totalorder %s2065_s19, %s2850_s1 }
  0x15   : > { %p2402_p13 = pneg %p2386_p11 }
  0x17   : > { %p2068_p0 = pnand %p2402_p13, %p2066_p12 }
  0x19   : > { %p2069_p3 = pneg %p2068_p0 }
  0x1b   : > { %p2074_p7 = pnand %p2072_p5, %p2069_p3 }
  0x1d   : > { %2077 = shalt.err (!%p2074_p7)
}
  0x1e   : > { %s2078_s10 = scalar_lea.vmem %s2379_s11, 1024  ;;  %p2086_p2 = scmp.lt.s32.totalorder %s2379_s11, %s2379_s11 }
  0x1f   : > { %p2079_p9 = scmp.ne.s32.totalorder %s2379_s11, %s2078_s10  ;;  %p2087_p6 = scmp.lt.s32.totalorder %s2078_s10, %s2078_s10 }
  0x21   : > { %p2081_p10 = pnand %p2079_p9, %p2402_p13  ;;  %p2088_p12 = por %p2087_p6, %p2086_p2 }
  0x23   : > { %p2082_p1 = pneg %p2081_p10 }
  0x25   : > { %p2089_p0 = pnand %p2088_p12, %p2082_p1 }
  0x27   : > { %2092 = shalt.err (!%p2089_p0)
}
  0x28   : > { %s2286_s13 = smov 64   ;;  %s2287_s15 = smov 4  }
  0x29   : > { %1963 = dma.hbm_to_vmem [thread:$0]  (!%p2386_p11), %s2850_s1, 1024, %s2379_s11, [#allocation6], %s2286_s13, %s2286_s13, %s2287_s15  }
  0x2a   : > { %s2093_s21 = scalar_lea.hbm %s2852_s3, 1024 }
  0x2b   : > { %p2094_p1 = scmp.ne.s32.totalorder %s2852_s3, %s2093_s21  ;;  %p2100_p10 = scmp.lt.u32.totalorder %s2093_s21, %s2852_s3 }
  0x2d   : > { %p2096_p2 = pnand %p2094_p1, %p2402_p13 }
  0x2f   : > { %p2097_p6 = pneg %p2096_p2 }
  0x31   : > { %p2102_p3 = pnand %p2100_p10, %p2097_p6 }
  0x33   : > { %2105 = shalt.err (!%p2102_p3)
}
  0x34   : > { %s2106_s11 = scalar_lea.vmem %s2390_s14, 1024  ;;  %p2114_p12 = scmp.lt.s32.totalorder %s2390_s14, %s2390_s14 }
  0x35   : > { %p2107_p5 = scmp.ne.s32.totalorder %s2390_s14, %s2106_s11  ;;  %p2115_p0 = scmp.lt.s32.totalorder %s2106_s11, %s2106_s11 }
  0x37   : > { %p2109_p7 = pnand %p2107_p5, %p2402_p13  ;;  %p2116_p1 = por %p2115_p0, %p2114_p12 }
  0x39   : > { %p2110_p9 = pneg %p2109_p7 }
  0x3b   : > { %p2117_p2 = pnand %p2116_p1, %p2110_p9 }
  0x3d   : > { %2120 = shalt.err (!%p2117_p2)
}
  0x3e   : > { %1969 = dma.hbm_to_vmem [thread:$0]  (!%p2386_p11), %s2852_s3, 1024, %s2390_s14, [#allocation9], %s2286_s13, %s2286_s13, %s2287_s15  }
  0x3f   : > { %s2121_s20 = scalar_lea.hbm %s2851_s2, 1024 }
  0x40   : > { %p2122_p6 = scmp.ne.s32.totalorder %s2851_s2, %s2121_s20  ;;  %p2128_p5 = scmp.lt.u32.totalorder %s2121_s20, %s2851_s2 }
  0x42   : > { %p2124_p10 = pnand %p2122_p6, %p2402_p13 }
  0x44   : > { %p2125_p3 = pneg %p2124_p10 }
  0x46   : > { %p2130_p7 = pnand %p2128_p5, %p2125_p3 }
  0x48   : > { %2133 = shalt.err (!%p2130_p7)
}
  0x49   : > { %s2134_s11 = scalar_lea.vmem %s234_s16, 1024  ;;  %p2142_p1 = scmp.lt.s32.totalorder %s234_s16, %s234_s16 }
  0x4a   : > { %p2135_p9 = scmp.ne.s32.totalorder %s234_s16, %s2134_s11  ;;  %p2143_p2 = scmp.lt.s32.totalorder %s2134_s11, %s2134_s11 }
  0x4c   : > { %p2137_p12 = pnand %p2135_p9, %p2402_p13  ;;  %p2144_p4 = por %p2143_p2, %p2142_p1 }
  0x4e   : > { %p2138_p0 = pneg %p2137_p12 }
  0x50   : > { %p2145_p8 = pnand %p2144_p4, %p2138_p0 }
  0x52   : > { %2148 = shalt.err (!%p2145_p8)
}
  0x53   : > { %1966 = dma.hbm_to_vmem [thread:$0]  (!%p2386_p11), %s2851_s2, 1024, %s234_s16, [#allocation6], %s2286_s13, %s2286_s13, %s2287_s15  }
  0x54   : > { %s2288_s17 = smov [#allocation10]   ;;  %s2149_s21 = scalar_lea.hbm %s2853_s4, 1024 }
  0x55   : > { %s259_s18 = sshll.u32 %s2288_s17, 4  ;;  %p2150_p4 = scmp.ne.s32.totalorder %s2853_s4, %s2149_s21  ;;  %s260_s18 = int_to_ptr.vmem [resolvable:$true] %s259_s18 }
  0x56   : > { %p2156_p10 = scmp.lt.u32.totalorder %s2149_s21, %s2853_s4 }
  0x57   : > { %p2152_p8 = pnand %p2150_p4, %p2402_p13 }
  0x59   : > { %p2153_p6 = pneg %p2152_p8 }
  0x5b   : > { %p2158_p3 = pnand %p2156_p10, %p2153_p6 }
  0x5d   : > { %2161 = shalt.err (!%p2158_p3)
}
  0x5e   : > { %s2162_s16 = scalar_lea.vmem %s260_s18, 1024  ;;  %p2170_p12 = scmp.lt.s32.totalorder %s260_s18, %s260_s18 }
  0x5f   : > { %p2163_p5 = scmp.ne.s32.totalorder %s260_s18, %s2162_s16  ;;  %p2171_p0 = scmp.lt.s32.totalorder %s2162_s16, %s2162_s16 }
  0x61   : > { %p2165_p7 = pnand %p2163_p5, %p2402_p13  ;;  %p2172_p1 = por %p2171_p0, %p2170_p12 }
  0x63   : > { %p2166_p9 = pneg %p2165_p7 }
  0x65   : > { %p2173_p2 = pnand %p2172_p1, %p2166_p9 }
  0x67   : > { %2176 = shalt.err (!%p2173_p2)
}
  0x68   : > { %1972 = dma.hbm_to_vmem [thread:$0]  (!%p2386_p11), %s2853_s4, 1024, %s260_s18, [#allocation9], %s2286_s13, %s2286_s13, %s2287_s15  }
  0x69   : > { %s2496_s22 = sadd.s32 1, %s2281_s27   ;;  %s32_s12 = sadd.s32 1, %s2277_s26 }
  0x6a   : > { %s29_s17 = ssub.s32 %s2281_s27, %s2496_s22  ;;  %p39_p13 = scmp.ne.s32.totalorder %s2277_s26, %s2273_s25 }
  0x6b   : > { %p30_p4 = scmp.eq.s32.totalorder %s29_s17, 0  ;;  %p40_p8 = scmp.eq.s32.totalorder %s2281_s27, 0 }
  0x6c   : > { %p2867_p6 = scmp.eq.s32.totalorder %s2356_s28, 1  ;;  %p1985_p3 = scmp.lt.s32.totalorder %s2281_s27, 2 }
  0x6d   : > { %s2512_s20 = scalar_select %p30_p4, %s2277_s26, %s32_s12  }
  0x6e   : > { %p2506_p10 = por %p2867_p6, %p39_p13  ;;  %p41_p5 = por %p40_p8, %p39_p13 }
  0x6f   : > { %s279_s21 = sand.u32 1, %s2277_s26   ;;  %s1650_s13 = sshll.u32 %s2281_s27, 12 }
  0x70   : > { %s1602_s23 = sshll.u32 %s279_s21, 8  ;;  %s2519_s29 = scalar_lea.hbm %s2849_s0, %s1650_s13 }
  0x71   : > { %s283_s10 = scalar_lea.vmem [#allocation2], %s1602_s23  ;;  %p2523_p11 = pnand %p1985_p3, %p41_p5 }
  0x72   : > { %s290_s11 = sshll.u32 %s283_s10, 4  ;;  %s2527_s14 = scalar_lea.sflag [#allocation3], %s279_s21  ;;  %s2521_s11 = int_to_ptr.vmem [resolvable:$true] %s290_s11 }
  0x73   : > { %s2177_s8 = scalar_lea.hbm %s2519_s29, 4096  ;;  %p2179_p9 = pneg %p2523_p11 }
  0x74   : > { %p2178_p7 = scmp.ne.s32.totalorder %s2519_s29, %s2177_s8  ;;  %s2182_s23 = scalar_lea.hbm %s2849_s0, 8192 }
  0x75   : > { %p2183_p1 = scmp.lt.u32.totalorder %s2519_s29, %s2849_s0  ;;  %p2184_p2 = scmp.lt.u32.totalorder %s2182_s23, %s2177_s8 }
  0x76   : > { %p2180_p12 = pnand %p2179_p9, %p2178_p7  ;;  %p2186_p4 = scmp.lt.u32.totalorder %s2177_s8, %s2519_s29 }
  0x77   : > { %p2185_p13 = por %p2184_p2, %p2183_p1 }
  0x78   : > { %p2181_p0 = pneg %p2180_p12 }
  0x79   : > { %p2187_p8 = por %p2186_p4, %p2185_p13 }
  0x7b   : > { %p2188_p6 = pnand %p2187_p8, %p2181_p0 }
  0x7d   : > { %2191 = shalt.err (!%p2188_p6)
}
  0x7e   : > { %s2192_s21 = scalar_lea.vmem %s2521_s11, 4096  ;;  %s2289_s18 = smov [#allocation2]  }
  0x7f   : > { %p2193_p3 = scmp.ne.s32.totalorder %s2521_s11, %s2192_s21  ;;  %s2197_s10 = sshll.u32 %s2289_s18, 4  ;;  %s2198_s10 = int_to_ptr.vmem [resolvable:$false] %s2197_s10 }
  0x80   : > { %s2199_s12 = scalar_lea.vmem %s2198_s10, 8192  ;;  %p2200_p12 = scmp.lt.s32.totalorder %s2521_s11, %s2198_s10 }
  0x81   : > { %p2195_p5 = pnand %p2193_p3, %p2179_p9  ;;  %p2201_p1 = scmp.lt.s32.totalorder %s2199_s12, %s2192_s21 }
  0x83   : > { %p2196_p7 = pneg %p2195_p5  ;;  %p2202_p2 = por %p2201_p1, %p2200_p12 }
  0x85   : > { %p2203_p13 = pnand %p2202_p2, %p2196_p7 }
  0x87   : > { %2206 = shalt.err (!%p2203_p13)
}
  0x88   : > { %s2290_s8 = smov 128   ;;  %s2291_s17 = smov 8  }
  0x89   : > { %1976 = dma.hbm_to_vmem [thread:$0]  (!%p2523_p11), %s2519_s29, 4096, %s2521_s11, %s2527_s14, %s2290_s8, %s2290_s8, %s2291_s17  }
  0x8a   : > { %p2870_p9 = scmp.ne.s32.totalorder %s2864_s9, 0 }
  0x8b   : > { %s2558_s23 = sand.u32 (!%p2870_p9), 1, %s2273_s25   ;;  %p2871_p0 = scmp.ne.s32.totalorder (!%p2870_p9), %s2861_s30, 0 }
  0x8c   : > { %302 = sbr.rel (%p2870_p9) target bundleno = 1140 (0x474), region = 48  ;;  %s1606_s13 = sshll.u32 (!%p2870_p9), %s2558_s23, 8 }
  0x8d   : > { %s305_s15 = scalar_lea.sflag (!%p2870_p9), [#allocation3], %s2558_s23  ;;  %s2564_s21 = scalar_lea.vmem (!%p2870_p9), [#allocation2], %s1606_s13 }
  0x93   : > { %2252 = dma.done.wait (%p2871_p0), %s305_s15, 4096  }
  0x94   : > { %2254 = vsyncadd (%p2871_p0), %s305_s15, 4294963200  ;;  %p2872_p11 = scmp.eq.s32.totalorder %s2356_s28, 0 }
  0x96   : > { %2256 = dma.done.wait (%p2872_p11), [#allocation6], 2048   ;;  %p2873_p4 = pmov %p2872_p11 }
  0x98   : > { %2258 = vsyncadd (%p2873_p4), [#allocation6], 4294965248  ;;  %p2874_p8 = pmov %p2873_p4 }
  0x99   : > { %p2875_p6 = pmov %p2873_p4 }
  0x9a   : > { %2260 = dma.done.wait (%p2874_p8), [#allocation9], 2048  }
  0x9b   : > { %2262 = vsyncadd (%p2875_p6), [#allocation9], 4294965248  ;;  %v2033_v0 = vld [vmem:[#allocation5] sm:$0xff]   ;;  %v2034_v1 = vld [vmem:[#allocation5 + $0x8] sm:$0xff]   ;;  %s2734_s16 = scalar_lea.vmem [#allocation11], %s1606_s13  ;;  %s1651_s14 = sshll.u32 %s2356_s28, 12 }
  0x9c   : > { %1748 = vmatprep.subr.bf16.mxu0 %v2033_v0  ;;  %v2035_v2 = vld [vmem:[#allocation5 + $0x10] sm:$0xff]   ;;  %v2036_v3 = vld [vmem:[#allocation5 + $0x18] sm:$0xff]   ;;  %v358_v4 = vld [vmem:[%s2564_s21] sm:$0xff]  ;;  %s1484_s18 = sshll.u32 %s2734_s16, 4  ;;  %s2799_s8 = scalar_lea.hbm %s2856_s7, %s1651_s14  ;;  %s2801_s18 = int_to_ptr.vmem [resolvable:$true] %s1484_s18 }
  0x9d   : > { %1749 = vmatpush3.bf16.msra.mxu0 %v2033_v0  ;;  %v359_v5 = vld [vmem:[%s2564_s21 + $0x8] sm:$0xff]  ;;  %v2037_v7 = vld [vmem:[#allocation5 + $0x20] sm:$0xff]   ;;  %v2039_v9 = vld [vmem:[#allocation5 + $0x30] sm:$0xff]   ;;  %s1471_s28 = scalar_lea.sflag [#allocation4], %s2558_s23  ;;  %s2207_s17 = scalar_lea.vmem %s2801_s18, 4096 }
  0x9e   : > { %1750 = vmatprep.subr.bf16.mxu0 %v2034_v1  ;;  %v391_v6 = vpack.c.bf16 %v359_v5, %v358_v4  ;;  %v2038_v8 = vld [vmem:[#allocation5 + $0x28] sm:$0xff]   ;;  %v2041_v10 = vld [vmem:[#allocation7] sm:$0xff]   ;;  %v2043_v12 = vld [vmem:[#allocation7 + $0x10] sm:$0xff]   ;;  %p2208_p3 = scmp.ne.s32.totalorder %s2801_s18, %s2207_s17  ;;  %s2292_s13 = smov [#allocation11]  }
  0x9f   : > { %v2042_v11 = vld [vmem:[#allocation7 + $0x8] sm:$0xff]   ;;  %1796 = vmatprep.subr.bf16.mxu1 %v2041_v10  ;;  %v2040_v13 = vld [vmem:[#allocation5 + $0x38] sm:$0xff]   ;;  %v360_v14 = vld [vmem:[%s2564_s21 + $0x10] sm:$0xff]  ;;  %s2211_s15 = sshll.u32 %s2292_s13, 4  ;;  %s2212_s15 = int_to_ptr.vmem [resolvable:$false] %s2211_s15 }
  0xa0   : > { %1764 = vmatprep.mubr.bf16.mxu0 %v391_v6  ;;  %1797 = vmatpush3.bf16.msra.mxu1 %v2041_v10  ;;  %v361_v15 = vld [vmem:[%s2564_s21 + $0x18] sm:$0xff]  ;;  %v362_v17 = vld [vmem:[%s2564_s21 + $0x20] sm:$0xff]  ;;  %v363_v18 = vld [vmem:[%s2564_s21 + $0x28] sm:$0xff]  ;;  %p2209_p5 = pnand %p2208_p3, %p2506_p10  ;;  %p2214_p12 = scmp.lt.s32.totalorder %s2801_s18, %s2212_s15 }
  0xa1   : > { %1751 = vmatpush3.bf16.msra.mxu0 %v2034_v1  ;;  %1798 = vmatprep.subr.bf16.mxu1 %v2042_v11  ;;  %v2044_v16 = vld [vmem:[#allocation7 + $0x18] sm:$0xff]   ;;  %v2045_v19 = vld [vmem:[#allocation7 + $0x20] sm:$0xff]   ;;  %v392_v20 = vpack.c.bf16 %v361_v15, %v360_v14  ;;  %v393_v21 = vpack.c.bf16 %v363_v18, %v362_v17  ;;  %v364_v22 = vld [vmem:[%s2564_s21 + $0x30] sm:$0xff] }
  0xa2   : > { %1752 = vmatprep.subr.bf16.mxu0 %v2035_v2  ;;  %v365_v23 = vld [vmem:[%s2564_s21 + $0x38] sm:$0xff]  ;;  %v2046_v24 = vld [vmem:[#allocation7 + $0x28] sm:$0xff]   ;;  %v366_v25 = vld [vmem:[%s2564_s21 + $0x40] sm:$0xff]  ;;  %p2210_p7 = pneg %p2209_p5 }
  0xa3   : > { %v367_v26 = vld [vmem:[%s2564_s21 + $0x48] sm:$0xff]  ;;  %v394_v27 = vpack.c.bf16 %v365_v23, %v364_v22  ;;  %v368_v29 = vld [vmem:[%s2564_s21 + $0x50] sm:$0xff]  ;;  %v369_v30 = vld [vmem:[%s2564_s21 + $0x58] sm:$0xff] }
  0xa4   : > { %1799 = vmatpush3.bf16.msra.mxu1 %v2042_v11  ;;  %v395_v28 = vpack.c.bf16 %v367_v26, %v366_v25  ;;  %v370_v31 = vld [vmem:[%s2564_s21 + $0x60] sm:$0xff]  ;;  %v371_v32 = vld [vmem:[%s2564_s21 + $0x68] sm:$0xff]  ;;  %v396_v33 = vpack.c.bf16 %v369_v30, %v368_v29  ;;  %v372_v35 = vld [vmem:[%s2564_s21 + $0x70] sm:$0xff] }
  0xa5   : > { %1753 = vmatpush3.bf16.msra.mxu0 %v2035_v2  ;;  %1800 = vmatprep.subr.bf16.mxu1 %v2043_v12  ;;  %v397_v34 = vpack.c.bf16 %v371_v32, %v370_v31  ;;  %v373_v36 = vld [vmem:[%s2564_s21 + $0x78] sm:$0xff]  ;;  %v374_v37 = vld [vmem:[%s2564_s21 + $0x80] sm:$0xff]  ;;  %v375_v38 = vld [vmem:[%s2564_s21 + $0x88] sm:$0xff] }
  0xa6   : > { %1754 = vmatprep.subr.bf16.mxu0 %v2036_v3  ;;  %v398_v39 = vpack.c.bf16 %v373_v36, %v372_v35  ;;  %v399_v40 = vpack.c.bf16 %v375_v38, %v374_v37  ;;  %v376_v41 = vld [vmem:[%s2564_s21 + $0x90] sm:$0xff]  ;;  %v377_v42 = vld [vmem:[%s2564_s21 + $0x98] sm:$0xff]  ;;  %v378_v43 = vld [vmem:[%s2564_s21 + $0xa0] sm:$0xff] }
  0xa7   : > { %v379_v44 = vld [vmem:[%s2564_s21 + $0xa8] sm:$0xff]  ;;  %v400_v45 = vpack.c.bf16 %v377_v42, %v376_v41  ;;  %v380_v47 = vld [vmem:[%s2564_s21 + $0xb0] sm:$0xff]  ;;  %v381_v48 = vld [vmem:[%s2564_s21 + $0xb8] sm:$0xff] }
  0xa8   : > { %1801 = vmatpush3.bf16.msra.mxu1 %v2043_v12  ;;  %v401_v46 = vpack.c.bf16 %v379_v44, %v378_v43  ;;  %v382_v49 = vld [vmem:[%s2564_s21 + $0xc0] sm:$0xff]  ;;  %v383_v50 = vld [vmem:[%s2564_s21 + $0xc8] sm:$0xff]  ;;  %v402_v51 = vpack.c.bf16 %v381_v48, %v380_v47  ;;  %v384_v53 = vld [vmem:[%s2564_s21 + $0xd0] sm:$0xff] }
  0xa9   : > { %1755 = vmatpush3.bf16.msra.mxu0 %v2036_v3  ;;  %1802 = vmatprep.subr.bf16.mxu1 %v2044_v16  ;;  %v403_v52 = vpack.c.bf16 %v383_v50, %v382_v49  ;;  %v385_v54 = vld [vmem:[%s2564_s21 + $0xd8] sm:$0xff]  ;;  %v386_v55 = vld [vmem:[%s2564_s21 + $0xe0] sm:$0xff]  ;;  %v387_v56 = vld [vmem:[%s2564_s21 + $0xe8] sm:$0xff] }
  0xaa   : > { %1756 = vmatprep.subr.bf16.mxu0 %v2037_v7  ;;  %v404_v57 = vpack.c.bf16 %v385_v54, %v384_v53  ;;  %v405_v58 = vpack.c.bf16 %v387_v56, %v386_v55  ;;  %v388_v59 = vld [vmem:[%s2564_s21 + $0xf0] sm:$0xff]  ;;  %v389_v60 = vld [vmem:[%s2564_s21 + $0xf8] sm:$0xff]  ;;  %v2049_v0 = vld [vmem:[#allocation8] sm:$0xff]   ;;  %s2213_s21 = scalar_lea.vmem %s2212_s15, 8192 }
  0xab   : > { %v406_v61 = vpack.c.bf16 %v389_v60, %v388_v59  ;;  %v2047_v62 = vld [vmem:[#allocation7 + $0x30] sm:$0xff]   ;;  %v2048_v63 = vld [vmem:[#allocation7 + $0x38] sm:$0xff]   ;;  %v2050_v1 = vld [vmem:[#allocation8 + $0x8] sm:$0xff]   ;;  %p2215_p1 = scmp.lt.s32.totalorder %s2213_s21, %s2207_s17 }
  0xac   : > { %1803 = vmatpush3.bf16.msra.mxu1 %v2044_v16  ;;  %v2051_v2 = vld [vmem:[#allocation8 + $0x10] sm:$0xff]   ;;  %v2052_v3 = vld [vmem:[#allocation8 + $0x18] sm:$0xff]   ;;  %v2053_v4 = vld [vmem:[#allocation8 + $0x20] sm:$0xff]  }
  0xad   : > { %1757 = vmatpush3.bf16.msra.mxu0 %v2037_v7  ;;  %1804 = vmatprep.subr.bf16.mxu1 %v2045_v19  ;;  %v2054_v5 = vld [vmem:[#allocation8 + $0x28] sm:$0xff]   ;;  %v2055_v6 = vld [vmem:[#allocation8 + $0x30] sm:$0xff]   ;;  %v423_v7 = vlaneseq  ;;  %v2616_v10 = vld [vmem:[%s2854_s5] sm:$0x7]  ;;  %p2216_p2 = por %p2215_p1, %p2214_p12 }
  0xae   : > { %1758 = vmatprep.subr.bf16.mxu0 %v2038_v8 }
  0xaf   : > { %p2217_p13 = pnand %p2216_p2, %p2210_p7 }
  0xb0   : > { %1805 = vmatpush3.bf16.msra.mxu1 %v2045_v19 }
  0xb1   : > { %1759 = vmatpush3.bf16.msra.mxu0 %v2038_v8  ;;  %1806 = vmatprep.subr.bf16.mxu1 %v2046_v24  ;;  %v2610_v8 = vshrl.u32 %v423_v7, 7 }
  0xb2   : > { %1760 = vmatprep.subr.bf16.mxu0 %v2039_v9 }
  0xb4   : > { %1807 = vmatpush3.bf16.msra.mxu1 %v2046_v24 }
  0xb5   : > { %1761 = vmatpush3.bf16.msra.mxu0 %v2039_v9  ;;  %1808 = vmatprep.subr.bf16.mxu1 %v2047_v62  ;;  %v425_v9 = vsub.s32 0, %v2610_v8 }
  0xb6   : > { %1762 = vmatprep.subr.bf16.mxu0 %v2040_v13 }
  0xb7   : > { %v2619_v11 = vrot.slane %v2616_v10, %v425_v9 }
  0xb8   : > { %1809 = vmatpush3.bf16.msra.mxu1 %v2047_v62 }
  0xb9   : > { %1763 = vmatpush3.bf16.msra.mxu0 %v2040_v13  ;;  %1810 = vmatprep.subr.bf16.mxu1 %v2048_v63 }
  0xba   : > { %1844 = vmatprep.subr.bf16.mxu0 %v2049_v0 }
  0xbc   : > { %1765 = vmatmul.mubr.bf16.vlgmr.msra.gmra.mrb[0].mxu0 %v392_v20  ;;  %1811 = vmatpush3.bf16.msra.mxu1 %v2048_v63 }
  0xbd   : > { %1768 = vmatprep.mubr.bf16.mxu0 %v393_v21  ;;  %1845 = vmatpush3.bf16.msra.mxu0 %v2049_v0 }
  0xbe   : > { %1846 = vmatprep.subr.bf16.mxu0 %v2050_v1 }
  0xc1   : > { %1847 = vmatpush3.bf16.msra.mxu0 %v2050_v1 }
  0xc2   : > { %1848 = vmatprep.subr.bf16.mxu0 %v2051_v2 }
  0xc4   : > { %1769 = vmatmul.mubr.bf16.gmra.mrb[4].mxu0 %v394_v27 }
  0xc5   : > { %1772 = vmatprep.mubr.bf16.mxu0 %v395_v28  ;;  %1849 = vmatpush3.bf16.msra.mxu0 %v2051_v2 }
  0xc6   : > { %1850 = vmatprep.subr.bf16.mxu0 %v2052_v3 }
  0xc9   : > { %1851 = vmatpush3.bf16.msra.mxu0 %v2052_v3 }
  0xca   : > { %1852 = vmatprep.subr.bf16.mxu0 %v2053_v4 }
  0xcc   : > { %1773 = vmatmul.mubr.bf16.gmra.mrb[8].mxu0 %v396_v33 }
  0xcd   : > { %1776 = vmatprep.mubr.bf16.mxu0 %v397_v34  ;;  %1853 = vmatpush3.bf16.msra.mxu0 %v2053_v4 }
  0xce   : > { %1854 = vmatprep.subr.bf16.mxu0 %v2054_v5 }
  0xd1   : > { %1855 = vmatpush3.bf16.msra.mxu0 %v2054_v5 }
  0xd2   : > { %1856 = vmatprep.subr.bf16.mxu0 %v2055_v6 }
  0xd4   : > { %1777 = vmatmul.mubr.bf16.gmra.mrb[12].mxu0 %v398_v39 }
  0xd5   : > { %1780 = vmatprep.mubr.bf16.mxu0 %v399_v40  ;;  %1857 = vmatpush3.bf16.msra.mxu0 %v2055_v6 }
  0xdc   : > { %1781 = vmatmul.mubr.bf16.gmra.mrb[16].mxu0 %v400_v45 }
  0xdd   : > { %1784 = vmatprep.mubr.bf16.mxu0 %v401_v46 }
  0xe4   : > { %1785 = vmatmul.mubr.bf16.gmra.mrb[20].mxu0 %v402_v51 }
  0xe5   : > { %1788 = vmatprep.mubr.bf16.mxu0 %v403_v52 }
  0xec   : > { %1789 = vmatmul.mubr.bf16.gmra.mrb[24].mxu0 %v404_v57 }
  0xed   : > { %1792 = vmatprep.mubr.bf16.mxu0 %v405_v58 }
  0xf4   : > { %1793 = vmatmul.mubr.bf16.gmra.mrb[28].mxu0 %v406_v61 }
 0x18f   : > { %v1766_v12 = vpop.f32.mrb[0].mxu0 }
 0x190   : > { %v518_v13 = vadd.f32 %v1766_v12, %v2619_v11  ;;  %v509_v14 = vpop.f32.mrb[1].mxu0 }
 0x191   : > { %v510_v15 = vadd.f32 %v509_v14, %v2619_v11  ;;  %v1767_v16 = vpop.f32.mrb[2].mxu0 }
 0x192   : > { %v521_v17 = vadd.f32 %v1767_v16, %v2619_v11  ;;  %v512_v18 = vpop.f32.mrb[3].mxu0  ;;  %v638_v20 = vmax.f32 %v518_v13, 0.0 }
 0x193   : > { %v513_v19 = vadd.f32 %v512_v18, %v2619_v11  ;;  %v636_v22 = vmax.f32 %v510_v15, 0.0 }
 0x194   : > { %v639_v21 = vmax.f32 %v521_v17, 0.0 }
 0x195   : > { %v637_v23 = vmax.f32 %v513_v19, 0.0 }
 0x196   : > { %v669_v24 = vpack.c.bf16 %v639_v21, %v638_v20 }
 0x197   : > { %v1770_v25 = vpop.f32.mrb[4].mxu0  ;;  %v668_v26 = vpack.c.bf16 %v637_v23, %v636_v22 }
 0x198   : > { %v534_v27 = vadd.f32 %v1770_v25, %v2619_v11  ;;  %v525_v28 = vpop.f32.mrb[5].mxu0 }
 0x199   : > { %v526_v29 = vadd.f32 %v525_v28, %v2619_v11  ;;  %v1771_v30 = vpop.f32.mrb[6].mxu0  ;;  %1812 = vmatprep.mubr.bf16.mxu1 %v668_v26 }
 0x19a   : > { %v537_v31 = vadd.f32 %v1771_v30, %v2619_v11  ;;  %v528_v32 = vpop.f32.mrb[7].mxu0  ;;  %1813 = vmatmul.mubr.bf16.vlgmr.msra.gmra.mrb[0].mxu1 %v669_v24  ;;  %v642_v34 = vmax.f32 %v534_v27, 0.0 }
 0x19b   : > { %v529_v33 = vadd.f32 %v528_v32, %v2619_v11  ;;  %v640_v36 = vmax.f32 %v526_v29, 0.0 }
 0x19c   : > { %v643_v35 = vmax.f32 %v537_v31, 0.0 }
 0x19d   : > { %v641_v37 = vmax.f32 %v529_v33, 0.0 }
 0x19e   : > { %v671_v38 = vpack.c.bf16 %v643_v35, %v642_v34 }
 0x19f   : > { %v670_v39 = vpack.c.bf16 %v641_v37, %v640_v36  ;;  %v1774_v40 = vpop.f32.mrb[8].mxu0 }
 0x1a0   : > { %v550_v41 = vadd.f32 %v1774_v40, %v2619_v11  ;;  %v541_v42 = vpop.f32.mrb[9].mxu0 }
 0x1a1   : > { %v542_v43 = vadd.f32 %v541_v42, %v2619_v11  ;;  %v1775_v44 = vpop.f32.mrb[10].mxu0  ;;  %1816 = vmatprep.mubr.bf16.mxu1 %v670_v39 }
 0x1a2   : > { %v553_v45 = vadd.f32 %v1775_v44, %v2619_v11  ;;  %v544_v46 = vpop.f32.mrb[11].mxu0  ;;  %1817 = vmatmul.mubr.bf16.gmra.mrb[4].mxu1 %v671_v38  ;;  %v646_v48 = vmax.f32 %v550_v41, 0.0 }
 0x1a3   : > { %v545_v47 = vadd.f32 %v544_v46, %v2619_v11  ;;  %v644_v50 = vmax.f32 %v542_v43, 0.0 }
 0x1a4   : > { %v647_v49 = vmax.f32 %v553_v45, 0.0 }
 0x1a5   : > { %v645_v51 = vmax.f32 %v545_v47, 0.0 }
 0x1a6   : > { %v673_v52 = vpack.c.bf16 %v647_v49, %v646_v48 }
 0x1a7   : > { %v672_v53 = vpack.c.bf16 %v645_v51, %v644_v50  ;;  %v1778_v54 = vpop.f32.mrb[12].mxu0 }
 0x1a8   : > { %v566_v55 = vadd.f32 %v1778_v54, %v2619_v11  ;;  %v557_v56 = vpop.f32.mrb[13].mxu0 }
 0x1a9   : > { %v558_v57 = vadd.f32 %v557_v56, %v2619_v11  ;;  %v1779_v58 = vpop.f32.mrb[14].mxu0  ;;  %1820 = vmatprep.mubr.bf16.mxu1 %v672_v53 }
 0x1aa   : > { %v569_v59 = vadd.f32 %v1779_v58, %v2619_v11  ;;  %v560_v60 = vpop.f32.mrb[15].mxu0  ;;  %1821 = vmatmul.mubr.bf16.gmra.mrb[8].mxu1 %v673_v52  ;;  %v650_v62 = vmax.f32 %v566_v55, 0.0 }
 0x1ab   : > { %v561_v61 = vadd.f32 %v560_v60, %v2619_v11  ;;  %v648_v0 = vmax.f32 %v558_v57, 0.0 }
 0x1ac   : > { %v651_v63 = vmax.f32 %v569_v59, 0.0 }
 0x1ad   : > { %v649_v1 = vmax.f32 %v561_v61, 0.0 }
 0x1ae   : > { %v675_v2 = vpack.c.bf16 %v651_v63, %v650_v62  ;;  %v2056_v63 = vld [vmem:[#allocation8 + $0x38] sm:$0xff]  }
 0x1af   : > { %v674_v3 = vpack.c.bf16 %v649_v1, %v648_v0  ;;  %v1782_v4 = vpop.f32.mrb[16].mxu0  ;;  %1858 = vmatprep.subr.bf16.mxu0 %v2056_v63  ;;  %v2057_v0 = vld [vmem:[#allocation10] sm:$0xff]   ;;  %v2058_v1 = vld [vmem:[#allocation10 + $0x8] sm:$0xff]  }
 0x1b0   : > { %v582_v5 = vadd.f32 %v1782_v4, %v2619_v11  ;;  %v573_v6 = vpop.f32.mrb[17].mxu0  ;;  %1859 = vmatpush3.bf16.msra.mxu0 %v2056_v63  ;;  %1892 = vmatprep.subr.bf16.mxu1 %v2057_v0  ;;  %v2062_v4 = vld [vmem:[#allocation10 + $0x28] sm:$0xff]  }
 0x1b1   : > { %v574_v7 = vadd.f32 %v573_v6, %v2619_v11  ;;  %v1783_v9 = vpop.f32.mrb[18].mxu0  ;;  %1824 = vmatprep.mubr.bf16.mxu1 %v674_v3  ;;  %1893 = vmatpush3.bf16.msra.mxu1 %v2057_v0  ;;  %v2061_v3 = vld [vmem:[#allocation10 + $0x20] sm:$0xff]   ;;  %v702_v6 = vsub.s32 1, %v2610_v8 }
 0x1b2   : > { %v585_v12 = vadd.f32 %v1783_v9, %v2619_v11  ;;  %v576_v13 = vpop.f32.mrb[19].mxu0  ;;  %1825 = vmatmul.mubr.bf16.gmra.mrb[12].mxu1 %v675_v2  ;;  %v654_v15 = vmax.f32 %v582_v5, 0.0  ;;  %1894 = vmatprep.subr.bf16.mxu1 %v2058_v1  ;;  %v2059_v2 = vld [vmem:[#allocation10 + $0x10] sm:$0xff]  }
 0x1b3   : > { %v577_v14 = vadd.f32 %v576_v13, %v2619_v11  ;;  %v652_v17 = vmax.f32 %v574_v7, 0.0  ;;  %v2063_v5 = vld [vmem:[#allocation10 + $0x30] sm:$0xff]   ;;  %v2655_v7 = vrot.slane %v2616_v10, %v702_v6 }
 0x1b4   : > { %v655_v16 = vmax.f32 %v585_v12, 0.0 }
 0x1b5   : > { %v653_v18 = vmax.f32 %v577_v14, 0.0  ;;  %1895 = vmatpush3.bf16.msra.mxu1 %v2058_v1 }
 0x1b6   : > { %v677_v19 = vpack.c.bf16 %v655_v16, %v654_v15  ;;  %1896 = vmatprep.subr.bf16.mxu1 %v2059_v2 }
 0x1b7   : > { %v676_v20 = vpack.c.bf16 %v653_v18, %v652_v17  ;;  %v1786_v21 = vpop.f32.mrb[20].mxu0 }
 0x1b8   : > { %v598_v22 = vadd.f32 %v1786_v21, %v2619_v11  ;;  %v589_v23 = vpop.f32.mrb[21].mxu0 }
 0x1b9   : > { %v590_v24 = vadd.f32 %v589_v23, %v2619_v11  ;;  %v1787_v25 = vpop.f32.mrb[22].mxu0  ;;  %1828 = vmatprep.mubr.bf16.mxu1 %v676_v20  ;;  %1897 = vmatpush3.bf16.msra.mxu1 %v2059_v2 }
 0x1ba   : > { %v601_v26 = vadd.f32 %v1787_v25, %v2619_v11  ;;  %v592_v27 = vpop.f32.mrb[23].mxu0  ;;  %1829 = vmatmul.mubr.bf16.gmra.mrb[16].mxu1 %v677_v19  ;;  %v658_v29 = vmax.f32 %v598_v22, 0.0 }
 0x1bb   : > { %v593_v28 = vadd.f32 %v592_v27, %v2619_v11  ;;  %v656_v31 = vmax.f32 %v590_v24, 0.0 }
 0x1bc   : > { %v659_v30 = vmax.f32 %v601_v26, 0.0 }
 0x1bd   : > { %v657_v32 = vmax.f32 %v593_v28, 0.0 }
 0x1be   : > { %v679_v33 = vpack.c.bf16 %v659_v30, %v658_v29 }
 0x1bf   : > { %v678_v34 = vpack.c.bf16 %v657_v32, %v656_v31  ;;  %v1790_v35 = vpop.f32.mrb[24].mxu0 }
 0x1c0   : > { %v614_v36 = vadd.f32 %v1790_v35, %v2619_v11  ;;  %v605_v37 = vpop.f32.mrb[25].mxu0 }
 0x1c1   : > { %v606_v38 = vadd.f32 %v605_v37, %v2619_v11  ;;  %v1791_v39 = vpop.f32.mrb[26].mxu0  ;;  %1832 = vmatprep.mubr.bf16.mxu1 %v678_v34 }
 0x1c2   : > { %v617_v40 = vadd.f32 %v1791_v39, %v2619_v11  ;;  %v608_v41 = vpop.f32.mrb[27].mxu0  ;;  %1833 = vmatmul.mubr.bf16.gmra.mrb[20].mxu1 %v679_v33  ;;  %v662_v43 = vmax.f32 %v614_v36, 0.0 }
 0x1c3   : > { %v609_v42 = vadd.f32 %v608_v41, %v2619_v11  ;;  %v660_v45 = vmax.f32 %v606_v38, 0.0 }
 0x1c4   : > { %v663_v44 = vmax.f32 %v617_v40, 0.0 }
 0x1c5   : > { %v661_v46 = vmax.f32 %v609_v42, 0.0 }
 0x1c6   : > { %v681_v47 = vpack.c.bf16 %v663_v44, %v662_v43 }
 0x1c7   : > { %v680_v48 = vpack.c.bf16 %v661_v46, %v660_v45  ;;  %v1794_v49 = vpop.f32.mrb[28].mxu0 }
 0x1c8   : > { %v630_v50 = vadd.f32 %v1794_v49, %v2619_v11  ;;  %v621_v51 = vpop.f32.mrb[29].mxu0 }
 0x1c9   : > { %v622_v52 = vadd.f32 %v621_v51, %v2619_v11  ;;  %v1795_v53 = vpop.f32.mrb[30].mxu0  ;;  %1836 = vmatprep.mubr.bf16.mxu1 %v680_v48 }
 0x1ca   : > { %v633_v54 = vadd.f32 %v1795_v53, %v2619_v11  ;;  %v624_v55 = vpop.f32.mrb[31].mxu0  ;;  %1837 = vmatmul.mubr.bf16.gmra.mrb[24].mxu1 %v681_v47  ;;  %v666_v57 = vmax.f32 %v630_v50, 0.0 }
 0x1cb   : > { %v625_v56 = vadd.f32 %v624_v55, %v2619_v11  ;;  %v664_v59 = vmax.f32 %v622_v52, 0.0  ;;  %v2060_v11 = vld [vmem:[#allocation10 + $0x18] sm:$0xff]  }
 0x1cc   : > { %v667_v58 = vmax.f32 %v633_v54, 0.0  ;;  %1898 = vmatprep.subr.bf16.mxu1 %v2060_v11 }
 0x1cd   : > { %v665_v60 = vmax.f32 %v625_v56, 0.0  ;;  %1899 = vmatpush3.bf16.msra.mxu1 %v2060_v11 }
 0x1ce   : > { %v683_v61 = vpack.c.bf16 %v667_v58, %v666_v57  ;;  %1900 = vmatprep.subr.bf16.mxu1 %v2061_v3 }
 0x1cf   : > { %v682_v62 = vpack.c.bf16 %v665_v60, %v664_v59 }
 0x1d1   : > { %1840 = vmatprep.mubr.bf16.mxu1 %v682_v62  ;;  %1901 = vmatpush3.bf16.msra.mxu1 %v2061_v3 }
 0x1d2   : > { %1841 = vmatmul.mubr.bf16.gmra.mrb[28].mxu1 %v683_v61  ;;  %1902 = vmatprep.subr.bf16.mxu1 %v2062_v4 }
 0x1d5   : > { %1903 = vmatpush3.bf16.msra.mxu1 %v2062_v4 }
 0x1d6   : > { %1904 = vmatprep.subr.bf16.mxu1 %v2063_v5 }
 0x1d9   : > { %1905 = vmatpush3.bf16.msra.mxu1 %v2063_v5 }
 0x26d   : > { %v1814_v9 = vpop.f32.mrb[0].mxu1 }
 0x26e   : > { %v786_v12 = vpop.f32.mrb[1].mxu1  ;;  %v795_v14 = vadd.f32 %v1814_v9, %v2655_v7 }
 0x26f   : > { %v1815_v13 = vpop.f32.mrb[2].mxu1  ;;  %v787_v17 = vadd.f32 %v786_v12, %v2655_v7 }
 0x270   : > { %v798_v15 = vadd.f32 %v1815_v13, %v2655_v7  ;;  %v789_v16 = vpop.f32.mrb[3].mxu1 }
 0x271   : > { %v790_v18 = vadd.f32 %v789_v16, %v2655_v7 }
 0x272   : > { %v914_v19 = vpack.c.bf16 %v798_v15, %v795_v14 }
 0x273   : > { %v913_v20 = vpack.c.bf16 %v790_v18, %v787_v17 }
 0x275   : > { %v1818_v21 = vpop.f32.mrb[4].mxu1  ;;  %1860 = vmatprep.mubr.bf16.mxu0 %v913_v20 }
 0x276   : > { %v802_v22 = vpop.f32.mrb[5].mxu1  ;;  %1861 = vmatmul.mubr.bf16.vlgmr.msra.gmra.mrb[32].mxu0 %v914_v19  ;;  %v811_v24 = vadd.f32 %v1818_v21, %v2655_v7 }
 0x277   : > { %v1819_v23 = vpop.f32.mrb[6].mxu1  ;;  %v803_v27 = vadd.f32 %v802_v22, %v2655_v7 }
 0x278   : > { %v814_v25 = vadd.f32 %v1819_v23, %v2655_v7  ;;  %v805_v26 = vpop.f32.mrb[7].mxu1 }
 0x279   : > { %v806_v28 = vadd.f32 %v805_v26, %v2655_v7 }
 0x27a   : > { %v916_v29 = vpack.c.bf16 %v814_v25, %v811_v24 }
 0x27b   : > { %v915_v30 = vpack.c.bf16 %v806_v28, %v803_v27 }
 0x27d   : > { %v1822_v31 = vpop.f32.mrb[8].mxu1  ;;  %1864 = vmatprep.mubr.bf16.mxu0 %v915_v30  ;;  %v2064_v30 = vld [vmem:[#allocation10 + $0x38] sm:$0xff]  }
 0x27e   : > { %v818_v32 = vpop.f32.mrb[9].mxu1  ;;  %1865 = vmatmul.mubr.bf16.gmra.mrb[36].mxu0 %v916_v29  ;;  %v827_v34 = vadd.f32 %v1822_v31, %v2655_v7  ;;  %1906 = vmatprep.subr.bf16.mxu1 %v2064_v30  ;;  %v947_v31 = vsub.s32 2, %v2610_v8 }
 0x27f   : > { %v1823_v33 = vpop.f32.mrb[10].mxu1  ;;  %v819_v37 = vadd.f32 %v818_v32, %v2655_v7  ;;  %1907 = vmatpush3.bf16.msra.mxu1 %v2064_v30 }
 0x280   : > { %v830_v35 = vadd.f32 %v1823_v33, %v2655_v7  ;;  %v821_v36 = vpop.f32.mrb[11].mxu1  ;;  %v2691_v32 = vrot.slane %v2616_v10, %v947_v31 }
 0x281   : > { %v822_v38 = vadd.f32 %v821_v36, %v2655_v7 }
 0x282   : > { %v918_v39 = vpack.c.bf16 %v830_v35, %v827_v34 }
 0x283   : > { %v917_v40 = vpack.c.bf16 %v822_v38, %v819_v37 }
 0x285   : > { %v1826_v41 = vpop.f32.mrb[12].mxu1  ;;  %1868 = vmatprep.mubr.bf16.mxu0 %v917_v40 }
 0x286   : > { %v834_v42 = vpop.f32.mrb[13].mxu1  ;;  %1869 = vmatmul.mubr.bf16.gmra.mrb[40].mxu0 %v918_v39  ;;  %v843_v44 = vadd.f32 %v1826_v41, %v2655_v7 }
 0x287   : > { %v1827_v43 = vpop.f32.mrb[14].mxu1  ;;  %v835_v47 = vadd.f32 %v834_v42, %v2655_v7 }
 0x288   : > { %v846_v45 = vadd.f32 %v1827_v43, %v2655_v7  ;;  %v837_v46 = vpop.f32.mrb[15].mxu1 }
 0x289   : > { %v838_v48 = vadd.f32 %v837_v46, %v2655_v7 }
 0x28a   : > { %v920_v49 = vpack.c.bf16 %v846_v45, %v843_v44 }
 0x28b   : > { %v919_v50 = vpack.c.bf16 %v838_v48, %v835_v47 }
 0x28d   : > { %v1830_v51 = vpop.f32.mrb[16].mxu1  ;;  %1872 = vmatprep.mubr.bf16.mxu0 %v919_v50 }
 0x28e   : > { %v850_v52 = vpop.f32.mrb[17].mxu1  ;;  %1873 = vmatmul.mubr.bf16.gmra.mrb[44].mxu0 %v920_v49  ;;  %v859_v54 = vadd.f32 %v1830_v51, %v2655_v7 }
 0x28f   : > { %v1831_v53 = vpop.f32.mrb[18].mxu1  ;;  %v851_v57 = vadd.f32 %v850_v52, %v2655_v7 }
 0x290   : > { %v862_v55 = vadd.f32 %v1831_v53, %v2655_v7  ;;  %v853_v56 = vpop.f32.mrb[19].mxu1 }
 0x291   : > { %v854_v58 = vadd.f32 %v853_v56, %v2655_v7 }
 0x292   : > { %v922_v59 = vpack.c.bf16 %v862_v55, %v859_v54 }
 0x293   : > { %v921_v60 = vpack.c.bf16 %v854_v58, %v851_v57 }
 0x295   : > { %v1834_v61 = vpop.f32.mrb[20].mxu1  ;;  %1876 = vmatprep.mubr.bf16.mxu0 %v921_v60 }
 0x296   : > { %v866_v62 = vpop.f32.mrb[21].mxu1  ;;  %1877 = vmatmul.mubr.bf16.gmra.mrb[48].mxu0 %v922_v59  ;;  %v875_v0 = vadd.f32 %v1834_v61, %v2655_v7 }
 0x297   : > { %v1835_v63 = vpop.f32.mrb[22].mxu1  ;;  %v867_v11 = vadd.f32 %v866_v62, %v2655_v7 }
 0x298   : > { %v878_v1 = vadd.f32 %v1835_v63, %v2655_v7  ;;  %v869_v2 = vpop.f32.mrb[23].mxu1 }
 0x299   : > { %v870_v3 = vadd.f32 %v869_v2, %v2655_v7 }
 0x29a   : > { %v924_v4 = vpack.c.bf16 %v878_v1, %v875_v0 }
 0x29b   : > { %v923_v5 = vpack.c.bf16 %v870_v3, %v867_v11 }
 0x29d   : > { %v1838_v6 = vpop.f32.mrb[24].mxu1  ;;  %1880 = vmatprep.mubr.bf16.mxu0 %v923_v5 }
 0x29e   : > { %v882_v9 = vpop.f32.mrb[25].mxu1  ;;  %1881 = vmatmul.mubr.bf16.gmra.mrb[52].mxu0 %v924_v4  ;;  %v891_v13 = vadd.f32 %v1838_v6, %v2655_v7 }
 0x29f   : > { %v1839_v12 = vpop.f32.mrb[26].mxu1  ;;  %v883_v16 = vadd.f32 %v882_v9, %v2655_v7 }
 0x2a0   : > { %v894_v14 = vadd.f32 %v1839_v12, %v2655_v7  ;;  %v885_v15 = vpop.f32.mrb[27].mxu1 }
 0x2a1   : > { %v886_v17 = vadd.f32 %v885_v15, %v2655_v7 }
 0x2a2   : > { %v926_v18 = vpack.c.bf16 %v894_v14, %v891_v13 }
 0x2a3   : > { %v925_v19 = vpack.c.bf16 %v886_v17, %v883_v16 }
 0x2a5   : > { %v1842_v20 = vpop.f32.mrb[28].mxu1  ;;  %1884 = vmatprep.mubr.bf16.mxu0 %v925_v19 }
 0x2a6   : > { %v898_v21 = vpop.f32.mrb[29].mxu1  ;;  %1885 = vmatmul.mubr.bf16.gmra.mrb[56].mxu0 %v926_v18  ;;  %v907_v23 = vadd.f32 %v1842_v20, %v2655_v7 }
 0x2a7   : > { %v1843_v22 = vpop.f32.mrb[30].mxu1  ;;  %v899_v26 = vadd.f32 %v898_v21, %v2655_v7 }
 0x2a8   : > { %v910_v24 = vadd.f32 %v1843_v22, %v2655_v7  ;;  %v901_v25 = vpop.f32.mrb[31].mxu1 }
 0x2a9   : > { %v902_v27 = vadd.f32 %v901_v25, %v2655_v7 }
 0x2aa   : > { %v928_v28 = vpack.c.bf16 %v910_v24, %v907_v23 }
 0x2ab   : > { %v927_v29 = vpack.c.bf16 %v902_v27, %v899_v26 }
 0x2ad   : > { %1888 = vmatprep.mubr.bf16.mxu0 %v927_v29 }
 0x2ae   : > { %1889 = vmatmul.mubr.bf16.gmra.mrb[60].mxu0 %v928_v28 }
 0x349   : > { %v1862_v33 = vpop.f32.mrb[32].mxu0 }
 0x34a   : > { %v1040_v34 = vadd.f32 %v1862_v33, %v2691_v32  ;;  %v1031_v35 = vpop.f32.mrb[33].mxu0 }
 0x34b   : > { %v1032_v36 = vadd.f32 %v1031_v35, %v2691_v32  ;;  %v1863_v37 = vpop.f32.mrb[34].mxu0 }
 0x34c   : > { %v1043_v7 = vadd.f32 %v1863_v37, %v2691_v32  ;;  %v1034_v38 = vpop.f32.mrb[35].mxu0  ;;  %v1160_v40 = vmax.f32 %v1040_v34, 0.0 }
 0x34d   : > { %v1035_v39 = vadd.f32 %v1034_v38, %v2691_v32  ;;  %v1158_v42 = vmax.f32 %v1032_v36, 0.0 }
 0x34e   : > { %v1161_v41 = vmax.f32 %v1043_v7, 0.0 }
 0x34f   : > { %v1159_v43 = vmax.f32 %v1035_v39, 0.0 }
 0x350   : > { %v1191_v8 = vpack.c.bf16 %v1161_v41, %v1160_v40 }
 0x351   : > { %v1190_v44 = vpack.c.bf16 %v1159_v43, %v1158_v42  ;;  %v1866_v10 = vpop.f32.mrb[36].mxu0 }
 0x352   : > { %v1056_v45 = vadd.f32 %v1866_v10, %v2691_v32  ;;  %v1047_v46 = vpop.f32.mrb[37].mxu0 }
 0x353   : > { %v1048_v47 = vadd.f32 %v1047_v46, %v2691_v32  ;;  %v1867_v48 = vpop.f32.mrb[38].mxu0  ;;  %1908 = vmatprep.mubr.bf16.mxu1 %v1190_v44 }
 0x354   : > { %v1059_v49 = vadd.f32 %v1867_v48, %v2691_v32  ;;  %v1050_v50 = vpop.f32.mrb[39].mxu0  ;;  %1909 = vmatmul.mubr.bf16.vlgmr.msra.gmra.mrb[32].mxu1 %v1191_v8  ;;  %v1164_v52 = vmax.f32 %v1056_v45, 0.0 }
 0x355   : > { %v1051_v51 = vadd.f32 %v1050_v50, %v2691_v32  ;;  %v1162_v54 = vmax.f32 %v1048_v47, 0.0 }
 0x356   : > { %v1165_v53 = vmax.f32 %v1059_v49, 0.0 }
 0x357   : > { %v1163_v55 = vmax.f32 %v1051_v51, 0.0 }
 0x358   : > { %v1193_v56 = vpack.c.bf16 %v1165_v53, %v1164_v52 }
 0x359   : > { %v1192_v57 = vpack.c.bf16 %v1163_v55, %v1162_v54  ;;  %v1870_v58 = vpop.f32.mrb[40].mxu0 }
 0x35a   : > { %v1072_v59 = vadd.f32 %v1870_v58, %v2691_v32  ;;  %v1063_v60 = vpop.f32.mrb[41].mxu0 }
 0x35b   : > { %v1064_v61 = vadd.f32 %v1063_v60, %v2691_v32  ;;  %v1871_v62 = vpop.f32.mrb[42].mxu0  ;;  %1912 = vmatprep.mubr.bf16.mxu1 %v1192_v57 }
 0x35c   : > { %v1075_v63 = vadd.f32 %v1871_v62, %v2691_v32  ;;  %v1066_v0 = vpop.f32.mrb[43].mxu0  ;;  %1913 = vmatmul.mubr.bf16.gmra.mrb[36].mxu1 %v1193_v56  ;;  %v1168_v2 = vmax.f32 %v1072_v59, 0.0 }
 0x35d   : > { %v1067_v1 = vadd.f32 %v1066_v0, %v2691_v32  ;;  %v1166_v3 = vmax.f32 %v1064_v61, 0.0 }
 0x35e   : > { %v1169_v11 = vmax.f32 %v1075_v63, 0.0 }
 0x35f   : > { %v1167_v4 = vmax.f32 %v1067_v1, 0.0 }
 0x360   : > { %v1195_v5 = vpack.c.bf16 %v1169_v11, %v1168_v2 }
 0x361   : > { %v1194_v6 = vpack.c.bf16 %v1167_v4, %v1166_v3  ;;  %v1874_v9 = vpop.f32.mrb[44].mxu0 }
 0x362   : > { %v1088_v12 = vadd.f32 %v1874_v9, %v2691_v32  ;;  %v1079_v13 = vpop.f32.mrb[45].mxu0 }
 0x363   : > { %v1080_v14 = vadd.f32 %v1079_v13, %v2691_v32  ;;  %v1875_v15 = vpop.f32.mrb[46].mxu0  ;;  %1916 = vmatprep.mubr.bf16.mxu1 %v1194_v6 }
 0x364   : > { %v1091_v16 = vadd.f32 %v1875_v15, %v2691_v32  ;;  %v1082_v17 = vpop.f32.mrb[47].mxu0  ;;  %1917 = vmatmul.mubr.bf16.gmra.mrb[40].mxu1 %v1195_v5  ;;  %v1172_v19 = vmax.f32 %v1088_v12, 0.0 }
 0x365   : > { %v1083_v18 = vadd.f32 %v1082_v17, %v2691_v32  ;;  %v1170_v21 = vmax.f32 %v1080_v14, 0.0 }
 0x366   : > { %v1173_v20 = vmax.f32 %v1091_v16, 0.0 }
 0x367   : > { %v1171_v22 = vmax.f32 %v1083_v18, 0.0  ;;  %v2728_v18 = vld [vmem:[%s2855_s6] ss:$0 sm:$0xff] }
 0x368   : > { %v1197_v23 = vpack.c.bf16 %v1173_v20, %v1172_v19 }
 0x369   : > { %v1196_v24 = vpack.c.bf16 %v1171_v22, %v1170_v21  ;;  %v1878_v25 = vpop.f32.mrb[48].mxu0 }
 0x36a   : > { %v1104_v26 = vadd.f32 %v1878_v25, %v2691_v32  ;;  %v1095_v27 = vpop.f32.mrb[49].mxu0 }
 0x36b   : > { %v1096_v28 = vadd.f32 %v1095_v27, %v2691_v32  ;;  %v1879_v29 = vpop.f32.mrb[50].mxu0  ;;  %1920 = vmatprep.mubr.bf16.mxu1 %v1196_v24 }
 0x36c   : > { %v1107_v30 = vadd.f32 %v1879_v29, %v2691_v32  ;;  %v1098_v31 = vpop.f32.mrb[51].mxu0  ;;  %1921 = vmatmul.mubr.bf16.gmra.mrb[44].mxu1 %v1197_v23  ;;  %v1176_v34 = vmax.f32 %v1104_v26, 0.0 }
 0x36d   : > { %v1099_v33 = vadd.f32 %v1098_v31, %v2691_v32  ;;  %v1174_v36 = vmax.f32 %v1096_v28, 0.0 }
 0x36e   : > { %v1177_v35 = vmax.f32 %v1107_v30, 0.0 }
 0x36f   : > { %v1175_v37 = vmax.f32 %v1099_v33, 0.0 }
 0x370   : > { %v1199_v7 = vpack.c.bf16 %v1177_v35, %v1176_v34 }
 0x371   : > { %v1198_v38 = vpack.c.bf16 %v1175_v37, %v1174_v36  ;;  %v1882_v39 = vpop.f32.mrb[52].mxu0 }
 0x372   : > { %v1120_v40 = vadd.f32 %v1882_v39, %v2691_v32  ;;  %v1111_v41 = vpop.f32.mrb[53].mxu0 }
 0x373   : > { %v1112_v42 = vadd.f32 %v1111_v41, %v2691_v32  ;;  %v1883_v43 = vpop.f32.mrb[54].mxu0  ;;  %1924 = vmatprep.mubr.bf16.mxu1 %v1198_v38 }
 0x374   : > { %v1123_v8 = vadd.f32 %v1883_v43, %v2691_v32  ;;  %v1114_v44 = vpop.f32.mrb[55].mxu0  ;;  %1925 = vmatmul.mubr.bf16.gmra.mrb[48].mxu1 %v1199_v7  ;;  %v1180_v45 = vmax.f32 %v1120_v40, 0.0 }
 0x375   : > { %v1115_v10 = vadd.f32 %v1114_v44, %v2691_v32  ;;  %v1178_v47 = vmax.f32 %v1112_v42, 0.0 }
 0x376   : > { %v1181_v46 = vmax.f32 %v1123_v8, 0.0 }
 0x377   : > { %v1179_v48 = vmax.f32 %v1115_v10, 0.0 }
 0x378   : > { %v1201_v49 = vpack.c.bf16 %v1181_v46, %v1180_v45 }
 0x379   : > { %v1200_v50 = vpack.c.bf16 %v1179_v48, %v1178_v47  ;;  %v1886_v51 = vpop.f32.mrb[56].mxu0 }
 0x37a   : > { %v1136_v52 = vadd.f32 %v1886_v51, %v2691_v32  ;;  %v1127_v53 = vpop.f32.mrb[57].mxu0 }
 0x37b   : > { %v1128_v54 = vadd.f32 %v1127_v53, %v2691_v32  ;;  %v1887_v55 = vpop.f32.mrb[58].mxu0  ;;  %1928 = vmatprep.mubr.bf16.mxu1 %v1200_v50 }
 0x37c   : > { %v1139_v56 = vadd.f32 %v1887_v55, %v2691_v32  ;;  %v1130_v57 = vpop.f32.mrb[59].mxu0  ;;  %1929 = vmatmul.mubr.bf16.gmra.mrb[52].mxu1 %v1201_v49  ;;  %v1184_v59 = vmax.f32 %v1136_v52, 0.0 }
 0x37d   : > { %v1131_v58 = vadd.f32 %v1130_v57, %v2691_v32  ;;  %v1182_v61 = vmax.f32 %v1128_v54, 0.0 }
 0x37e   : > { %v1185_v60 = vmax.f32 %v1139_v56, 0.0 }
 0x37f   : > { %v1183_v62 = vmax.f32 %v1131_v58, 0.0 }
 0x380   : > { %v1203_v63 = vpack.c.bf16 %v1185_v60, %v1184_v59 }
 0x381   : > { %v1202_v0 = vpack.c.bf16 %v1183_v62, %v1182_v61  ;;  %v1890_v1 = vpop.f32.mrb[60].mxu0 }
 0x382   : > { %v1152_v2 = vadd.f32 %v1890_v1, %v2691_v32  ;;  %v1143_v11 = vpop.f32.mrb[61].mxu0 }
 0x383   : > { %v1144_v3 = vadd.f32 %v1143_v11, %v2691_v32  ;;  %v1891_v4 = vpop.f32.mrb[62].mxu0  ;;  %1932 = vmatprep.mubr.bf16.mxu1 %v1202_v0 }
 0x384   : > { %v1155_v5 = vadd.f32 %v1891_v4, %v2691_v32  ;;  %v1146_v6 = vpop.f32.mrb[63].mxu0  ;;  %1933 = vmatmul.mubr.bf16.gmra.mrb[56].mxu1 %v1203_v63  ;;  %v1188_v12 = vmax.f32 %v1152_v2, 0.0 }
 0x385   : > { %v1147_v9 = vadd.f32 %v1146_v6, %v2691_v32  ;;  %v1186_v14 = vmax.f32 %v1144_v3, 0.0 }
 0x386   : > { %v1189_v13 = vmax.f32 %v1155_v5, 0.0 }
 0x387   : > { %v1187_v15 = vmax.f32 %v1147_v9, 0.0 }
 0x388   : > { %v1205_v16 = vpack.c.bf16 %v1189_v13, %v1188_v12 }
 0x389   : > { %v1204_v17 = vpack.c.bf16 %v1187_v15, %v1186_v14 }
 0x38b   : > { %1936 = vmatprep.mubr.bf16.mxu1 %v1204_v17 }
 0x38c   : > { %1937 = vmatmul.mubr.bf16.gmra.mrb[60].mxu1 %v1205_v16 }
 0x427   : > { %v1910_v19 = vpop.f32.mrb[32].mxu1 }
 0x428   : > { %v1320_v20 = vadd.f32 %v1910_v19, %v2728_v18  ;;  %v1311_v21 = vpop.f32.mrb[33].mxu1 }
 0x429   : > { %v1312_v22 = vadd.f32 %v2728_v18, %v1311_v21  ;;  %v1911_v32 = vpop.f32.mrb[34].mxu1 }
 0x42a   : > { %1440 = vst [vmem:[%s2734_s16 + $0x10] sm:$0xff] %v1320_v20  ;;  %v1323_v23 = vadd.f32 %v1911_v32, %v2728_v18  ;;  %v1314_v24 = vpop.f32.mrb[35].mxu1 }
 0x42b   : > { %1438 = vst [vmem:[%s2734_s16] sm:$0xff] %v1312_v22  ;;  %v1315_v25 = vadd.f32 %v2728_v18, %v1314_v24 }
 0x42c   : > { %1441 = vst [vmem:[%s2734_s16 + $0x18] sm:$0xff] %v1323_v23 }
 0x42d   : > { %1439 = vst [vmem:[%s2734_s16 + $0x8] sm:$0xff] %v1315_v25 }
 0x42f   : > { %v1914_v26 = vpop.f32.mrb[36].mxu1 }
 0x430   : > { %v1336_v27 = vadd.f32 %v1914_v26, %v2728_v18  ;;  %v1327_v28 = vpop.f32.mrb[37].mxu1 }
 0x431   : > { %v1328_v29 = vadd.f32 %v2728_v18, %v1327_v28  ;;  %v1915_v30 = vpop.f32.mrb[38].mxu1 }
 0x432   : > { %1444 = vst [vmem:[%s2734_s16 + $0x30] sm:$0xff] %v1336_v27  ;;  %v1339_v31 = vadd.f32 %v1915_v30, %v2728_v18  ;;  %v1330_v33 = vpop.f32.mrb[39].mxu1 }
 0x433   : > { %1442 = vst [vmem:[%s2734_s16 + $0x20] sm:$0xff] %v1328_v29  ;;  %v1331_v34 = vadd.f32 %v2728_v18, %v1330_v33 }
 0x434   : > { %1445 = vst [vmem:[%s2734_s16 + $0x38] sm:$0xff] %v1339_v31 }
 0x435   : > { %1443 = vst [vmem:[%s2734_s16 + $0x28] sm:$0xff] %v1331_v34 }
 0x437   : > { %v1918_v35 = vpop.f32.mrb[40].mxu1 }
 0x438   : > { %v1352_v36 = vadd.f32 %v1918_v35, %v2728_v18  ;;  %v1343_v37 = vpop.f32.mrb[41].mxu1 }
 0x439   : > { %v1344_v7 = vadd.f32 %v2728_v18, %v1343_v37  ;;  %v1919_v38 = vpop.f32.mrb[42].mxu1 }
 0x43a   : > { %1448 = vst [vmem:[%s2734_s16 + $0x50] sm:$0xff] %v1352_v36  ;;  %v1355_v39 = vadd.f32 %v1919_v38, %v2728_v18  ;;  %v1346_v40 = vpop.f32.mrb[43].mxu1 }
 0x43b   : > { %1446 = vst [vmem:[%s2734_s16 + $0x40] sm:$0xff] %v1344_v7  ;;  %v1347_v41 = vadd.f32 %v2728_v18, %v1346_v40 }
 0x43c   : > { %1449 = vst [vmem:[%s2734_s16 + $0x58] sm:$0xff] %v1355_v39 }
 0x43d   : > { %1447 = vst [vmem:[%s2734_s16 + $0x48] sm:$0xff] %v1347_v41 }
 0x43f   : > { %v1922_v42 = vpop.f32.mrb[44].mxu1 }
 0x440   : > { %v1368_v43 = vadd.f32 %v1922_v42, %v2728_v18  ;;  %v1359_v8 = vpop.f32.mrb[45].mxu1 }
 0x441   : > { %v1360_v44 = vadd.f32 %v2728_v18, %v1359_v8  ;;  %v1923_v10 = vpop.f32.mrb[46].mxu1 }
 0x442   : > { %1452 = vst [vmem:[%s2734_s16 + $0x70] sm:$0xff] %v1368_v43  ;;  %v1371_v45 = vadd.f32 %v1923_v10, %v2728_v18  ;;  %v1362_v46 = vpop.f32.mrb[47].mxu1 }
 0x443   : > { %1450 = vst [vmem:[%s2734_s16 + $0x60] sm:$0xff] %v1360_v44  ;;  %v1363_v47 = vadd.f32 %v2728_v18, %v1362_v46 }
 0x444   : > { %1453 = vst [vmem:[%s2734_s16 + $0x78] sm:$0xff] %v1371_v45 }
 0x445   : > { %1451 = vst [vmem:[%s2734_s16 + $0x68] sm:$0xff] %v1363_v47 }
 0x447   : > { %v1926_v48 = vpop.f32.mrb[48].mxu1 }
 0x448   : > { %v1384_v49 = vadd.f32 %v1926_v48, %v2728_v18  ;;  %v1375_v50 = vpop.f32.mrb[49].mxu1 }
 0x449   : > { %v1376_v51 = vadd.f32 %v2728_v18, %v1375_v50  ;;  %v1927_v52 = vpop.f32.mrb[50].mxu1 }
 0x44a   : > { %1456 = vst [vmem:[%s2734_s16 + $0x90] sm:$0xff] %v1384_v49  ;;  %v1387_v53 = vadd.f32 %v1927_v52, %v2728_v18  ;;  %v1378_v54 = vpop.f32.mrb[51].mxu1 }
 0x44b   : > { %1454 = vst [vmem:[%s2734_s16 + $0x80] sm:$0xff] %v1376_v51  ;;  %v1379_v55 = vadd.f32 %v2728_v18, %v1378_v54 }
 0x44c   : > { %1457 = vst [vmem:[%s2734_s16 + $0x98] sm:$0xff] %v1387_v53 }
 0x44d   : > { %1455 = vst [vmem:[%s2734_s16 + $0x88] sm:$0xff] %v1379_v55 }
 0x44f   : > { %v1930_v56 = vpop.f32.mrb[52].mxu1 }
 0x450   : > { %v1400_v57 = vadd.f32 %v1930_v56, %v2728_v18  ;;  %v1391_v58 = vpop.f32.mrb[53].mxu1 }
 0x451   : > { %v1392_v59 = vadd.f32 %v2728_v18, %v1391_v58  ;;  %v1931_v60 = vpop.f32.mrb[54].mxu1 }
 0x452   : > { %1460 = vst [vmem:[%s2734_s16 + $0xb0] sm:$0xff] %v1400_v57  ;;  %v1403_v61 = vadd.f32 %v1931_v60, %v2728_v18  ;;  %v1394_v62 = vpop.f32.mrb[55].mxu1 }
 0x453   : > { %1458 = vst [vmem:[%s2734_s16 + $0xa0] sm:$0xff] %v1392_v59  ;;  %v1395_v63 = vadd.f32 %v2728_v18, %v1394_v62 }
 0x454   : > { %1461 = vst [vmem:[%s2734_s16 + $0xb8] sm:$0xff] %v1403_v61 }
 0x455   : > { %1459 = vst [vmem:[%s2734_s16 + $0xa8] sm:$0xff] %v1395_v63 }
 0x457   : > { %v1934_v0 = vpop.f32.mrb[56].mxu1 }
 0x458   : > { %v1416_v1 = vadd.f32 %v1934_v0, %v2728_v18  ;;  %v1407_v2 = vpop.f32.mrb[57].mxu1 }
 0x459   : > { %v1408_v11 = vadd.f32 %v2728_v18, %v1407_v2  ;;  %v1935_v3 = vpop.f32.mrb[58].mxu1 }
 0x45a   : > { %1464 = vst [vmem:[%s2734_s16 + $0xd0] sm:$0xff] %v1416_v1  ;;  %v1419_v4 = vadd.f32 %v1935_v3, %v2728_v18  ;;  %v1410_v5 = vpop.f32.mrb[59].mxu1 }
 0x45b   : > { %1462 = vst [vmem:[%s2734_s16 + $0xc0] sm:$0xff] %v1408_v11  ;;  %v1411_v6 = vadd.f32 %v2728_v18, %v1410_v5 }
 0x45c   : > { %1465 = vst [vmem:[%s2734_s16 + $0xd8] sm:$0xff] %v1419_v4 }
 0x45d   : > { %1463 = vst [vmem:[%s2734_s16 + $0xc8] sm:$0xff] %v1411_v6 }
 0x45f   : > { %v1938_v9 = vpop.f32.mrb[60].mxu1 }
 0x460   : > { %v1432_v12 = vadd.f32 %v1938_v9, %v2728_v18  ;;  %v1423_v13 = vpop.f32.mrb[61].mxu1 }
 0x461   : > { %v1424_v14 = vadd.f32 %v2728_v18, %v1423_v13  ;;  %v1939_v15 = vpop.f32.mrb[62].mxu1 }
 0x462   : > { %1468 = vst [vmem:[%s2734_s16 + $0xf0] sm:$0xff] %v1432_v12  ;;  %v1435_v16 = vadd.f32 %v1939_v15, %v2728_v18  ;;  %v1426_v17 = vpop.f32.mrb[63].mxu1 }
 0x463   : > { %1466 = vst [vmem:[%s2734_s16 + $0xe0] sm:$0xff] %v1424_v14  ;;  %v1427_v19 = vadd.f32 %v2728_v18, %v1426_v17 }
 0x464   : > { %1469 = vst [vmem:[%s2734_s16 + $0xf8] sm:$0xff] %v1435_v16 }
 0x465   : > { %1467 = vst [vmem:[%s2734_s16 + $0xe8] sm:$0xff] %v1427_v19 }
 0x466   : > { %2220 = shalt.err (!%p2217_p13)
}
 0x467   : > { %s2221_s30 = scalar_lea.hbm %s2799_s8, 4096  ;;  %s2225_s11 = scalar_lea.hbm %s2856_s7, 8192 }
 0x468   : > { %p2222_p9 = scmp.ne.s32.totalorder %s2799_s8, %s2221_s30  ;;  %p2226_p4 = scmp.lt.u32.totalorder %s2799_s8, %s2856_s7 }
 0x469   : > { %p2227_p8 = scmp.lt.u32.totalorder %s2225_s11, %s2221_s30  ;;  %p2229_p3 = scmp.lt.u32.totalorder %s2221_s30, %s2799_s8 }
 0x46a   : > { %p2223_p0 = pnand %p2222_p9, %p2506_p10 }
 0x46b   : > { %p2228_p6 = por %p2227_p8, %p2226_p4 }
 0x46c   : > { %p2224_p11 = pneg %p2223_p0 }
 0x46d   : > { %p2230_p5 = por %p2229_p3, %p2228_p6 }
 0x46f   : > { %p2231_p7 = pnand %p2230_p5, %p2224_p11 }
 0x471   : > { %2234 = shalt.err (!%p2231_p7)
}
 0x472   : > { %s2293_s10 = smov 128   ;;  %s2294_s12 = smov 8  }
 0x473   : > { %1958 = dma.vmem_to_hbm [thread:$0]  (%p2506_p10), %s2801_s18, 4096, %s2799_s8, %s1471_s28, %s2293_s10, %s2293_s10, %s2294_s12  }
 0x474 PF: > { %s2876_s17 = sld [smem:[#allocation16_spill]]  ;;  %s1499_s13 = sand.u32 1, %s2269_s24  }
 0x475   : > { %p2878_p1 = scmp.ge.s32.totalorder %s2281_s27, 2  ;;  %s1500_s15 = scalar_lea.sflag [#allocation4], %s1499_s13 }
 0x47a   : > { %p2877_p12 = scmp.ne.s32.totalorder %s2876_s17, 0 }
 0x47c   : > { %p1978_p2 = pnand %p2878_p1, %p2877_p12 }
 0x47e   : > { %2264 = dma.done.wait (!%p1978_p2), %s1500_s15, 4096  }
 0x47f   : > { %2266 = vsyncadd (!%p1978_p2), %s1500_s15, 4294963200  ;;  %p22_p13 = scmp.ge.s32.totalorder %s2496_s22, 4   ;;  %s2879_s24 = smov %s2273_s25 }
 0x480   : > { %s2880_s25 = smov %s2277_s26  ;;  %s2881_s26 = smov %s2512_s20 }
 0x481   : > { %s2882_s27 = smov %s2496_s22  ;;  %24 = sbr.rel (!%p22_p13) target bundleno = 7 (0x7), region = 109 }
 0x488   :  { %1505 = vsyncpa [#allocation3], 1 }
 0x489   :  { %1507 = vsyncpa [#allocation3 + $0x1], 1 }
 0x48a   :  { %1508 = vsyncpa [#allocation6], 1 }
 0x48b   :  { %1509 = vsyncpa [#allocation9], 1 }
 0x48c   :  { %1510 = vsyncpa [#allocation4], 1 }
 0x48d   :  { %1512 = vsyncpa [#allocation4 + $0x1], 1 }

</bundles_post_ra>
